<compile_context>
chip_gen: v5e
topology: v5e:2x2
jax: 0.10.0
libtpu: 0.0.40
codegen_flags: <defaults>
</compile_context>

<pallas_src>
import jax
import jax.numpy as jnp
import numpy as np
from jax.experimental import pallas as pl
from jax.experimental.pallas import tpu as pltpu

MAX_LEN = 10
HIDDEN = 32
OUTPUT = 64  # vocab size (output_dim)

_ENC_R0 = 8  # row offset of encoder outputs inside the activation slab (8-aligned)


# ----------------------------------------------------------------------------
# Kernel
# ----------------------------------------------------------------------------
def _make_kernel(H, O, L, Lp, PACK, enc_r0):
    """One decode step per grid index; weights stay VMEM-resident across the grid."""

    def kernel(emb_tbl_ref, act_ref, w_ref, out_ref, h_scr, emb_scr):
        t = pl.program_id(0)
        f32 = jnp.float32

        # Step 0: load initial hidden + wrapper-gathered embedding into carried scratch.
        @pl.when(t == 0)
        def _init():
            emb_scr[...] = act_ref[0:1, :]
            h_scr[...] = act_ref[1:2, :]

        emb = emb_scr[...]                                        # (1, H)
        h = h_scr[...]                                            # (1, H)

        # emb/h projections, lane-packed: [att logits (0:Lp) | combine-from-emb (Lp:Lp+H)].
        ge = jnp.dot(emb, w_ref[0:H, :], preferred_element_type=f32)        # (1, 128)
        gh = jnp.dot(h, w_ref[H:2 * H, :], preferred_element_type=f32)      # (1, 128)

        # Attention softmax over padded width (pad lanes biased to -1e30 -> exp == 0).
        att = ge[:, :Lp] + gh[:, :Lp] + w_ref[6 * H:6 * H + 1, :Lp]         # (1, Lp)
        m = jnp.max(att, axis=-1, keepdims=True)
        e = jnp.exp(att - m)
        attn = e * pl.reciprocal(jnp.sum(e, axis=-1, keepdims=True), approx=False)

        # Context + attention_combine (+ReLU); combine-from-emb part reused from ge.
        ctx = jnp.dot(attn, act_ref[enc_r0:enc_r0 + Lp, :],
                      preferred_element_type=f32)                           # (1, H)
        gc = jnp.dot(ctx, w_ref[2 * H:3 * H, :], preferred_element_type=f32)
        x = jnp.maximum(
            ge[:, Lp:Lp + H] + gc[:, :H] + w_ref[6 * H + 1:6 * H + 2, :H], 0.0)

        # GRU cell: single fused (1,2H)@(2H,4H) lane-dense matmul.
        # Output lanes: [rz pre-act (0:2H) | n from x (2H:3H) | n from h (3H:4H)].
        xh = jnp.concatenate([x, h], axis=1)                                # (1, 2H)
        g = jnp.dot(xh, w_ref[3 * H:5 * H, :], preferred_element_type=f32)  # (1, 4H)
        g = g + w_ref[6 * H + 2:6 * H + 3, :]
        r = jax.nn.sigmoid(g[:, 0:H])
        z = jax.nn.sigmoid(g[:, H:2 * H])
        n = jnp.tanh(g[:, 2 * H:3 * H] + r * g[:, 3 * H:4 * H])
        h_new = (1.0 - z) * n + z * h                                       # (1, H)

        # Output projection + log_softmax.
        o = jnp.dot(h_new, w_ref[5 * H:6 * H, :], preferred_element_type=f32)
        logits = o[:, :O] + w_ref[6 * H + 3:6 * H + 4, :O]                  # (1, O)
        mo = jnp.max(logits, axis=-1, keepdims=True)
        sh = logits - mo
        logp = sh - jnp.log(jnp.sum(jnp.exp(sh), axis=-1, keepdims=True))   # (1, O)

        # Greedy next token, fully vectorized (first-max tie-break == argmax).
        lane = jax.lax.broadcasted_iota(jnp.int32, logits.shape, 1)
        cand = jnp.where(logits >= mo, lane, jnp.int32(O))
        amin = jnp.min(cand, axis=-1, keepdims=True)
        onehot = (cand == amin).astype(f32)                                 # (1, O)
        tok_f = jnp.sum(onehot * lane.astype(f32), axis=-1, keepdims=True)  # (1, 1)

        # Carry state to the next decode step (embedding via one-hot matmul -> no
        # scalar extraction, no dynamic sublane gather).
        h_scr[...] = h_new
        emb_scr[...] = jnp.dot(onehot, emb_tbl_ref[...], preferred_element_type=f32)

        # One lane-dense packed row per step: [logp | h_new | attn | next-token].
        pad = PACK - (O + H + Lp)
        row = jnp.concatenate(
            [logp, h_new, attn, jnp.broadcast_to(tok_f, (1, pad))], axis=1)  # (1, PACK)
        out_ref[pl.ds(t, 1), :] = row

    return kernel


# ----------------------------------------------------------------------------
# Parameters
# ----------------------------------------------------------------------------
def init_params(key, hidden=HIDDEN, output=OUTPUT, max_len=MAX_LEN):
    """PyTorch-layout parameters (Linear weights are (out, in))."""
    ks = jax.random.split(key, 11)

    def u(k, shape, fan_in):
        s = 1.0 / np.sqrt(fan_in)
        return jax.random.uniform(k, shape, jnp.float32, -s, s)

    return {
        'embedding': jax.random.normal(ks[0], (output, hidden), jnp.float32),
        'attn_w':   u(ks[1], (max_len, 2 * hidden), 2 * hidden),
        'attn_b':   u(ks[2], (max_len,), 2 * hidden),
        'comb_w':   u(ks[3], (hidden, 2 * hidden), 2 * hidden),
        'comb_b':   u(ks[4], (hidden,), 2 * hidden),
        'gru_w_ih': u(ks[5], (3 * hidden, hidden), hidden),
        'gru_w_hh': u(ks[6], (3 * hidden, hidden), hidden),
        'gru_b_ih': u(ks[7], (3 * hidden,), hidden),
        'gru_b_hh': u(ks[8], (3 * hidden,), hidden),
        'out_w':    u(ks[9], (output, hidden), hidden),
        'out_b':    u(ks[10], (output,), hidden),
    }


def prepare_params(params):
    """One-time packing of all weights/biases into a single MXU-friendly slab."""
    O, H = params['embedding'].shape
    L = params['attn_w'].shape[0]
    Lp = ((L + 7) // 8) * 8                         # padded attention length (10 -> 16)
    W_LANES = ((max(4 * H, O, Lp + H) + 127) // 128) * 128
    PACK = ((O + H + Lp + 1 + 127) // 128) * 128    # packed output row width
    R = 6 * H + 8                                   # weight-slab rows (incl. bias rows)

    w = jnp.zeros((R, W_LANES), jnp.float32)
    # emb -> [att logits | combine-from-emb]
    w = w.at[0:H, 0:L].set(params['attn_w'][:, :H].T)
    w = w.at[0:H, Lp:Lp + H].set(params['comb_w'][:, :H].T)
    # h -> att logits
    w = w.at[H:2 * H, 0:L].set(params['attn_w'][:, H:].T)
    # ctx -> combine
    w = w.at[2 * H:3 * H, 0:H].set(params['comb_w'][:, H:].T)
    # fused GRU weight: rows 3H:4H act on x (W_ih), rows 4H:5H act on h (W_hh),
    # lanes [rz (0:2H) | n_x (2H:3H) | n_h (3H:4H)], zero cross-blocks.
    w_ih_t = params['gru_w_ih'].T
    w_hh_t = params['gru_w_hh'].T
    w = w.at[3 * H:4 * H, 0:2 * H].set(w_ih_t[:, :2 * H])
    w = w.at[3 * H:4 * H, 2 * H:3 * H].set(w_ih_t[:, 2 * H:])
    w = w.at[4 * H:5 * H, 0:2 * H].set(w_hh_t[:, :2 * H])
    w = w.at[4 * H:5 * H, 3 * H:4 * H].set(w_hh_t[:, 2 * H:])
    # output projection
    w = w.at[5 * H:6 * H, 0:O].set(params['out_w'].T)
    # bias rows (row 6H..6H+3); attention pad lanes get -1e30 so padded softmax is exact.
    w = w.at[6 * H, 0:L].set(params['attn_b'])
    w = w.at[6 * H, L:Lp].set(jnp.full((Lp - L,), -1e30, jnp.float32))
    w = w.at[6 * H + 1, 0:H].set(params['comb_b'])
    b_g = jnp.concatenate([params['gru_b_ih'][:2 * H] + params['gru_b_hh'][:2 * H],
                           params['gru_b_ih'][2 * H:], params['gru_b_hh'][2 * H:]])
    w = w.at[6 * H + 2, 0:4 * H].set(b_g)
    w = w.at[6 * H + 3, 0:O].set(params['out_b'])

    return {
        'embedding': params['embedding'].astype(jnp.float32),
        'w': w,
        'H': H, 'O': O, 'L': L, 'Lp': Lp, 'PACK': PACK, 'ENC_R0': _ENC_R0,
    }


# ----------------------------------------------------------------------------
# Wrappers
# ----------------------------------------------------------------------------
def _run_decoder(emb0, h0, enc, packed, num_steps):
    H, O, L, Lp = packed['H'], packed['O'], packed['L'], packed['Lp']
    PACK, enc_r0 = packed['PACK'], packed['ENC_R0']
    R, W_LANES = packed['w'].shape
    T = int(num_steps)

    # Activation slab: row 0 = embedding of the first token (wrapper-side gather),
    # row 1 = initial hidden, rows enc_r0:enc_r0+L = encoder outputs (zero padded).
    act = jnp.zeros((enc_r0 + Lp, H), jnp.float32)
    act = act.at[0, :].set(jnp.asarray(emb0, jnp.float32).reshape(H))
    act = act.at[1, :].set(jnp.asarray(h0, jnp.float32).reshape(H))
    act = act.at[enc_r0:enc_r0 + L, :].set(jnp.asarray(enc, jnp.float32))

    kernel = _make_kernel(H, O, L, Lp, PACK, enc_r0)

    out = pl.pallas_call(
        kernel,
        out_shape=jax.ShapeDtypeStruct((T, PACK), jnp.float32),
        grid_spec=pltpu.PrefetchScalarGridSpec(
            num_scalar_prefetch=0,
            grid=(T,),
            in_specs=[
                pl.BlockSpec((O, H), lambda t: (0, 0)),            # embedding table
                pl.BlockSpec((enc_r0 + Lp, H), lambda t: (0, 0)),  # activation slab
                pl.BlockSpec((R, W_LANES), lambda t: (0, 0)),      # weight slab
            ],
            out_specs=pl.BlockSpec((T, PACK), lambda t: (0, 0)),
            scratch_shapes=[pltpu.VMEM((1, H), jnp.float32),       # carried hidden
                            pltpu.VMEM((1, H), jnp.float32)],      # carried embedding
        ),
        compiler_params=pltpu.CompilerParams(
            dimension_semantics=("arbitrary",)),
    )(packed['embedding'], act, packed['w'])
    return out  # (T, PACK)


def attention_decoder_gru(inp, hidden, encoder_outputs, packed):
    """Single-step module forward (T=1). Returns (log_softmax, hidden, attn_weights)."""
    H, O, L = packed['H'], packed['O'], packed['L']
    idx = jnp.clip(jnp.asarray(inp, jnp.int32), 0, O - 1)  # unchecked gathers -> clamp
    emb0 = packed['embedding'][idx]
    out = _run_decoder(emb0, hidden, encoder_outputs, packed, 1)
    logp = out[:, :O]
    h_new = out[:, O:O + H].reshape(1, 1, H)
    attn = out[:, O + H:O + H + L]
    return logp, h_new, attn


def greedy_decode(start_tok, hidden, encoder_outputs, packed, num_steps):
    """Fixed-length greedy rollout fully inside one kernel launch."""
    H, O, L, Lp = packed['H'], packed['O'], packed['L'], packed['Lp']
    idx = jnp.clip(jnp.asarray(start_tok, jnp.int32), 0, O - 1)
    emb0 = packed['embedding'][idx]
    out = _run_decoder(emb0, hidden, encoder_outputs, packed, num_steps)
    logp = out[:, :O]                                           # (T, O)
    attn = out[:, O + H:O + H + L]                              # (T, L)
    h_last = out[num_steps - 1, O:O + H].reshape(1, 1, H)
    next_toks = out[:, O + H + Lp].astype(jnp.int32)            # greedy pick per step
    return logp, h_last, attn, next_toks


# ----------------------------------------------------------------------------
# Pure-JAX references (eval mode)
# ----------------------------------------------------------------------------
def reference(inp, hidden, encoder_outputs, params):
    O, H = params['embedding'].shape
    hp = jax.lax.Precision.HIGHEST
    emb = params['embedding'][jnp.asarray(inp, jnp.int32)].reshape(1, H)
    h = hidden.reshape(1, H)
    cat = jnp.concatenate([emb, h], axis=1)
    attn = jax.nn.softmax(jnp.dot(cat, params['attn_w'].T, precision=hp)
                          + params['attn_b'], axis=1)
    ctx = jnp.dot(attn, encoder_outputs, precision=hp)
    comb = (jnp.dot(jnp.concatenate([emb, ctx], axis=1), params['comb_w'].T,
                    precision=hp) + params['comb_b'])
    x = jnp.maximum(comb, 0.0)
    gi = jnp.dot(x, params['gru_w_ih'].T, precision=hp) + params['gru_b_ih']
    gh = jnp.dot(h, params['gru_w_hh'].T, precision=hp) + params['gru_b_hh']
    r = jax.nn.sigmoid(gi[:, :H] + gh[:, :H])
    z = jax.nn.sigmoid(gi[:, H:2 * H] + gh[:, H:2 * H])
    n = jnp.tanh(gi[:, 2 * H:] + r * gh[:, 2 * H:])
    hn = (1.0 - z) * n + z * h
    logp = jax.nn.log_softmax(jnp.dot(hn, params['out_w'].T, precision=hp)
                              + params['out_b'], axis=1)
    return logp, hn.reshape(1, 1, H), attn


def reference_greedy(start_tok, hidden, encoder_outputs, params, steps):
    tok = jnp.asarray(start_tok, jnp.int32)
    h = hidden
    logps, attns, toks = [], [], []
    for _ in range(steps):
        logp, h, attn = reference(tok, h, encoder_outputs, params)
        tok = jnp.argmax(logp[0]).astype(jnp.int32)
        logps.append(logp)
        attns.append(attn)
        toks.append(tok)
    return jnp.concatenate(logps, 0), h, jnp.concatenate(attns, 0), jnp.stack(toks)


# ----------------------------------------------------------------------------
if __name__ == "__main__":
    key = jax.random.PRNGKey(0)
    kp, kh, ke = jax.random.split(key, 3)

    params = init_params(kp)
    packed = prepare_params(params)                 # one-time weight packing
    jax.block_until_ready((packed['embedding'], packed['w']))

    inp = jnp.array(3, dtype=jnp.int32)             # current target token id
    hidden = jax.random.normal(kh, (1, 1, HIDDEN), jnp.float32)
    encoder_outputs = jax.random.normal(ke, (MAX_LEN, HIDDEN), jnp.float32)

    # --- single-step module forward (== AttentionDecoderGRU.forward) ---
    logp, h_new, attn = attention_decoder_gru(inp, hidden, encoder_outputs, packed)
    jax.block_until_ready((logp, h_new, attn))
    r_logp, r_h, r_attn = reference(inp, hidden, encoder_outputs, params)
    assert logp.shape == (1, OUTPUT) and h_new.shape == (1, 1, HIDDEN) and attn.shape == (1, MAX_LEN)
    np.testing.assert_allclose(np.asarray(logp), np.asarray(r_logp), rtol=1e-3, atol=1e-4)
    np.testing.assert_allclose(np.asarray(h_new), np.asarray(r_h), rtol=1e-3, atol=1e-4)
    np.testing.assert_allclose(np.asarray(attn), np.asarray(r_attn), rtol=1e-3, atol=1e-4)

    # --- multi-step greedy decode fused into a single kernel launch ---
    T = MAX_LEN
    d_logp, d_h, d_attn, d_toks = greedy_decode(inp, hidden, encoder_outputs, packed, T)
    jax.block_until_ready((d_logp, d_h, d_attn, d_toks))
    g_logp, g_h, g_attn, g_toks = reference_greedy(inp, hidden, encoder_outputs, params, T)
    np.testing.assert_allclose(np.asarray(d_logp), np.asarray(g_logp), rtol=1e-3, atol=1e-4)
    np.testing.assert_allclose(np.asarray(d_h), np.asarray(g_h), rtol=1e-3, atol=1e-4)
    np.testing.assert_allclose(np.asarray(d_attn), np.asarray(g_attn), rtol=1e-3, atol=1e-4)
    assert np.array_equal(np.asarray(d_toks), np.asarray(g_toks))

    print("KERNEL_OK")
</pallas_src>

<mosaic_0001>
module attributes {stable_mosaic.version = 11 : i64} {
  func.func @kernel(%arg0: i32, %arg1: memref<64x32xf32, #tpu.memory_space<vmem>>, %arg2: memref<24x32xf32, #tpu.memory_space<vmem>>, %arg3: memref<200x128xf32, #tpu.memory_space<vmem>>, %arg4: memref<1x128xf32, #tpu.memory_space<vmem>>, %arg5: memref<1x32xf32, #tpu.memory_space<vmem>>, %arg6: memref<1x32xf32, #tpu.memory_space<vmem>>) attributes {dimension_semantics = [#tpu.dimension_semantics<arbitrary>], iteration_bounds = array<i64: 1>, scalar_prefetch = 0 : i64, scratch_operands = 2 : i64, tpu.core_type = #tpu.core_type<tc>, window_params = [{pipeline_mode = #tpu.pipeline_mode<synchronous>, transform_indices = @transform_0, window_bounds = array<i64: 64, 32>}, {pipeline_mode = #tpu.pipeline_mode<synchronous>, transform_indices = @transform_1, window_bounds = array<i64: 24, 32>}, {pipeline_mode = #tpu.pipeline_mode<synchronous>, transform_indices = @transform_2, window_bounds = array<i64: 200, 128>}, {pipeline_mode = #tpu.pipeline_mode<synchronous>, transform_indices = @transform_3, window_bounds = array<i64: 1, 128>}]} {
    %c0_i32 = arith.constant 0 : i32
    %0 = arith.cmpi eq, %arg0, %c0_i32 : i32
    %1 = arith.extui %0 : i1 to i32
    %c0_i32_0 = arith.constant 0 : i32
    %2 = arith.cmpi ne, %1, %c0_i32_0 : i32
    scf.if %2 {
      %c0_38 = arith.constant 0 : index
      %c0_39 = arith.constant 0 : index
      %101 = vector.load %arg2[%c0_38, %c0_39] : memref<24x32xf32, #tpu.memory_space<vmem>>, vector<1x32xf32>
      %c0_40 = arith.constant 0 : index
      %c0_41 = arith.constant 0 : index
      %102 = vector.load %arg6[%c0_40, %c0_41] : memref<1x32xf32, #tpu.memory_space<vmem>>, vector<1x32xf32>
      tpu.vector_store %arg6[%c0_40, %c0_41], %101 {strides = array<i32>} : memref<1x32xf32, #tpu.memory_space<vmem>>, vector<1x32xf32>,
      %c1 = arith.constant 1 : index
      %c0_42 = arith.constant 0 : index
      %103 = vector.load %arg2[%c1, %c0_42] : memref<24x32xf32, #tpu.memory_space<vmem>>, vector<1x32xf32>
      %c0_43 = arith.constant 0 : index
      %c0_44 = arith.constant 0 : index
      %104 = vector.load %arg5[%c0_43, %c0_44] : memref<1x32xf32, #tpu.memory_space<vmem>>, vector<1x32xf32>
      tpu.vector_store %arg5[%c0_43, %c0_44], %103 {strides = array<i32>} : memref<1x32xf32, #tpu.memory_space<vmem>>, vector<1x32xf32>,
    } else {
    }
    %c0 = arith.constant 0 : index
    %c0_1 = arith.constant 0 : index
    %3 = vector.load %arg6[%c0, %c0_1] : memref<1x32xf32, #tpu.memory_space<vmem>>, vector<1x32xf32>
    %c0_2 = arith.constant 0 : index
    %c0_3 = arith.constant 0 : index
    %4 = vector.load %arg5[%c0_2, %c0_3] : memref<1x32xf32, #tpu.memory_space<vmem>>, vector<1x32xf32>
    %c0_4 = arith.constant 0 : index
    %c0_5 = arith.constant 0 : index
    %5 = vector.load %arg3[%c0_4, %c0_5] : memref<200x128xf32, #tpu.memory_space<vmem>>, vector<32x128xf32>
    %cst = arith.constant dense<0.000000e+00> : vector<1x128xf32>
    %6 = tpu.matmul %3, %5, %cst {dimension_numbers = #tpu.dot_dimension_numbers<[1], [0], [0], [1], [0, 0, 1, 1], [], []>} : vector<1x32xf32>, vector<32x128xf32>, vector<1x128xf32> -> vector<1x128xf32>
    %c32 = arith.constant 32 : index
    %c0_6 = arith.constant 0 : index
    %7 = vector.load %arg3[%c32, %c0_6] : memref<200x128xf32, #tpu.memory_space<vmem>>, vector<32x128xf32>
    %cst_7 = arith.constant dense<0.000000e+00> : vector<1x128xf32>
    %8 = tpu.matmul %4, %7, %cst_7 {dimension_numbers = #tpu.dot_dimension_numbers<[1], [0], [0], [1], [0, 0, 1, 1], [], []>} : vector<1x32xf32>, vector<32x128xf32>, vector<1x128xf32> -> vector<1x128xf32>
    %9 = vector.extract_strided_slice %6 {offsets = [0, 0], sizes = [1, 16], strides = [1, 1]} : vector<1x128xf32> to vector<1x16xf32>
    %10 = vector.extract_strided_slice %8 {offsets = [0, 0], sizes = [1, 16], strides = [1, 1]} : vector<1x128xf32> to vector<1x16xf32>
    %11 = arith.addf %9, %10 : vector<1x16xf32>
    %c192 = arith.constant 192 : index
    %c0_8 = arith.constant 0 : index
    %12 = vector.load %arg3[%c192, %c0_8] : memref<200x128xf32, #tpu.memory_space<vmem>>, vector<1x16xf32>
    %13 = arith.addf %11, %12 : vector<1x16xf32>
    %cst_9 = arith.constant dense<0xFF800000> : vector<1xf32>
    %14 = vector.multi_reduction <maximumf>, %13, %cst_9 [1] : vector<1x16xf32> to vector<1xf32>
    %15 = vector.shape_cast %14 : vector<1xf32> to vector<1x1xf32>
    %16 = vector.broadcast %15 : vector<1x1xf32> to vector<1x16xf32>
    %17 = arith.subf %13, %16 : vector<1x16xf32>
    %18 = math.exp %17 : vector<1x16xf32>
    %cst_10 = arith.constant dense<0.000000e+00> : vector<1xf32>
    %19 = vector.multi_reduction <add>, %18, %cst_10 [1] : vector<1x16xf32> to vector<1xf32>
    %20 = vector.shape_cast %19 : vector<1xf32> to vector<1x1xf32>
    %21 = tpu.reciprocal %20 : vector<1x1xf32> -> vector<1x1xf32>
    %22 = vector.broadcast %21 : vector<1x1xf32> to vector<1x16xf32>
    %23 = arith.mulf %18, %22 : vector<1x16xf32>
    %c8 = arith.constant 8 : index
    %c0_11 = arith.constant 0 : index
    %24 = vector.load %arg2[%c8, %c0_11] : memref<24x32xf32, #tpu.memory_space<vmem>>, vector<16x32xf32>
    %cst_12 = arith.constant dense<0.000000e+00> : vector<1x32xf32>
    %25 = tpu.matmul %23, %24, %cst_12 {dimension_numbers = #tpu.dot_dimension_numbers<[1], [0], [0], [1], [0, 0, 1, 1], [], []>} : vector<1x16xf32>, vector<16x32xf32>, vector<1x32xf32> -> vector<1x32xf32>
    %c64 = arith.constant 64 : index
    %c0_13 = arith.constant 0 : index
    %26 = vector.load %arg3[%c64, %c0_13] : memref<200x128xf32, #tpu.memory_space<vmem>>, vector<32x128xf32>
    %cst_14 = arith.constant dense<0.000000e+00> : vector<1x128xf32>
    %27 = tpu.matmul %25, %26, %cst_14 {dimension_numbers = #tpu.dot_dimension_numbers<[1], [0], [0], [1], [0, 0, 1, 1], [], []>} : vector<1x32xf32>, vector<32x128xf32>, vector<1x128xf32> -> vector<1x128xf32>
    %28 = vector.extract_strided_slice %6 {offsets = [0, 16], sizes = [1, 32], strides = [1, 1]} : vector<1x128xf32> to vector<1x32xf32>
    %29 = vector.extract_strided_slice %27 {offsets = [0, 0], sizes = [1, 32], strides = [1, 1]} : vector<1x128xf32> to vector<1x32xf32>
    %30 = arith.addf %28, %29 : vector<1x32xf32>
    %c193 = arith.constant 193 : index
    %c0_15 = arith.constant 0 : index
    %31 = vector.load %arg3[%c193, %c0_15] : memref<200x128xf32, #tpu.memory_space<vmem>>, vector<1x32xf32>
    %32 = arith.addf %30, %31 : vector<1x32xf32>
    %cst_16 = arith.constant 0.000000e+00 : f32
    %33 = vector.broadcast %cst_16 : f32 to vector<1x32xf32>
    %34 = arith.maximumf %32, %33 : vector<1x32xf32>
    %35 = tpu.concatenate %34, %4 in 1 : vector<1x32xf32>, vector<1x32xf32> -> vector<1x64xf32>
    %c96 = arith.constant 96 : index
    %c0_17 = arith.constant 0 : index
    %36 = vector.load %arg3[%c96, %c0_17] : memref<200x128xf32, #tpu.memory_space<vmem>>, vector<64x128xf32>
    %cst_18 = arith.constant dense<0.000000e+00> : vector<1x128xf32>
    %37 = tpu.matmul %35, %36, %cst_18 {dimension_numbers = #tpu.dot_dimension_numbers<[1], [0], [0], [1], [0, 0, 1, 1], [], []>} : vector<1x64xf32>, vector<64x128xf32>, vector<1x128xf32> -> vector<1x128xf32>
    %c194 = arith.constant 194 : index
    %c0_19 = arith.constant 0 : index
    %38 = vector.load %arg3[%c194, %c0_19] : memref<200x128xf32, #tpu.memory_space<vmem>>, vector<1x128xf32>
    %39 = arith.addf %37, %38 : vector<1x128xf32>
    %40 = vector.extract_strided_slice %39 {offsets = [0, 0], sizes = [1, 32], strides = [1, 1]} : vector<1x128xf32> to vector<1x32xf32>
    %41 = arith.negf %40 : vector<1x32xf32>
    %42 = math.exp %41 : vector<1x32xf32>
    %cst_20 = arith.constant 1.000000e+00 : f32
    %43 = vector.broadcast %cst_20 : f32 to vector<1x32xf32>
    %44 = arith.addf %43, %42 : vector<1x32xf32>
    %45 = arith.divf %43, %44 : vector<1x32xf32>
    %46 = vector.extract_strided_slice %39 {offsets = [0, 32], sizes = [1, 32], strides = [1, 1]} : vector<1x128xf32> to vector<1x32xf32>
    %47 = arith.negf %46 : vector<1x32xf32>
    %48 = math.exp %47 : vector<1x32xf32>
    %cst_21 = arith.constant 1.000000e+00 : f32
    %49 = vector.broadcast %cst_21 : f32 to vector<1x32xf32>
    %50 = arith.addf %49, %48 : vector<1x32xf32>
    %51 = arith.divf %49, %50 : vector<1x32xf32>
    %52 = vector.extract_strided_slice %39 {offsets = [0, 64], sizes = [1, 32], strides = [1, 1]} : vector<1x128xf32> to vector<1x32xf32>
    %53 = vector.extract_strided_slice %39 {offsets = [0, 96], sizes = [1, 32], strides = [1, 1]} : vector<1x128xf32> to vector<1x32xf32>
    %54 = arith.mulf %45, %53 : vector<1x32xf32>
    %55 = arith.addf %52, %54 : vector<1x32xf32>
    %56 = math.tanh %55 : vector<1x32xf32>
    %cst_22 = arith.constant 1.000000e+00 : f32
    %57 = vector.broadcast %cst_22 : f32 to vector<1x32xf32>
    %58 = arith.subf %57, %51 : vector<1x32xf32>
    %59 = arith.mulf %58, %56 : vector<1x32xf32>
    %60 = arith.mulf %51, %4 : vector<1x32xf32>
    %61 = arith.addf %59, %60 : vector<1x32xf32>
    %c160 = arith.constant 160 : index
    %c0_23 = arith.constant 0 : index
    %62 = vector.load %arg3[%c160, %c0_23] : memref<200x128xf32, #tpu.memory_space<vmem>>, vector<32x128xf32>
    %cst_24 = arith.constant dense<0.000000e+00> : vector<1x128xf32>
    %63 = tpu.matmul %61, %62, %cst_24 {dimension_numbers = #tpu.dot_dimension_numbers<[1], [0], [0], [1], [0, 0, 1, 1], [], []>} : vector<1x32xf32>, vector<32x128xf32>, vector<1x128xf32> -> vector<1x128xf32>
    %64 = vector.extract_strided_slice %63 {offsets = [0, 0], sizes = [1, 64], strides = [1, 1]} : vector<1x128xf32> to vector<1x64xf32>
    %c195 = arith.constant 195 : index
    %c0_25 = arith.constant 0 : index
    %65 = vector.load %arg3[%c195, %c0_25] : memref<200x128xf32, #tpu.memory_space<vmem>>, vector<1x64xf32>
    %66 = arith.addf %64, %65 : vector<1x64xf32>
    %cst_26 = arith.constant dense<0xFF800000> : vector<1xf32>
    %67 = vector.multi_reduction <maximumf>, %66, %cst_26 [1] : vector<1x64xf32> to vector<1xf32>
    %68 = vector.shape_cast %67 : vector<1xf32> to vector<1x1xf32>
    %69 = vector.broadcast %68 : vector<1x1xf32> to vector<1x64xf32>
    %70 = arith.subf %66, %69 : vector<1x64xf32>
    %71 = math.exp %70 : vector<1x64xf32>
    %cst_27 = arith.constant dense<0.000000e+00> : vector<1xf32>
    %72 = vector.multi_reduction <add>, %71, %cst_27 [1] : vector<1x64xf32> to vector<1xf32>
    %73 = vector.shape_cast %72 : vector<1xf32> to vector<1x1xf32>
    %74 = math.log %73 : vector<1x1xf32>
    %75 = vector.broadcast %74 : vector<1x1xf32> to vector<1x64xf32>
    %76 = arith.subf %70, %75 : vector<1x64xf32>
    %77 = tpu.iota {dimensions = array<i32: 1>} : vector<1x64xi32>
    %78 = vector.broadcast %68 : vector<1x1xf32> to vector<1x64xf32>
    %79 = arith.cmpf oge, %66, %78 : vector<1x64xf32>
    %c64_i32 = arith.constant 64 : i32
    %80 = vector.broadcast %c64_i32 : i32 to vector<1x64xi32>
    %81 = arith.select %79, %77, %80 : vector<1x64xi1>, vector<1x64xi32>
    %cst_28 = arith.constant dense<2147483647> : vector<1xi32>
    %82 = vector.multi_reduction <minsi>, %81, %cst_28 [1] : vector<1x64xi32> to vector<1xi32>
    %83 = vector.shape_cast %82 : vector<1xi32> to vector<1x1xi32>
    %84 = vector.broadcast %83 : vector<1x1xi32> to vector<1x64xi32>
    %85 = arith.cmpi eq, %81, %84 : vector<1x64xi32>
    %86 = arith.extui %85 : vector<1x64xi1> to vector<1x64xi32>
    %87 = arith.sitofp %86 : vector<1x64xi32> to vector<1x64xf32>
    %88 = arith.sitofp %77 : vector<1x64xi32> to vector<1x64xf32>
    %89 = arith.mulf %87, %88 : vector<1x64xf32>
    %cst_29 = arith.constant dense<0.000000e+00> : vector<1xf32>
    %90 = vector.multi_reduction <add>, %89, %cst_29 [1] : vector<1x64xf32> to vector<1xf32>
    %91 = vector.shape_cast %90 : vector<1xf32> to vector<1x1xf32>
    %c0_30 = arith.constant 0 : index
    %c0_31 = arith.constant 0 : index
    %92 = vector.load %arg5[%c0_30, %c0_31] : memref<1x32xf32, #tpu.memory_space<vmem>>, vector<1x32xf32>
    tpu.vector_store %arg5[%c0_30, %c0_31], %61 {strides = array<i32>} : memref<1x32xf32, #tpu.memory_space<vmem>>, vector<1x32xf32>,
    %c0_32 = arith.constant 0 : index
    %c0_33 = arith.constant 0 : index
    %93 = vector.load %arg1[%c0_32, %c0_33] : memref<64x32xf32, #tpu.memory_space<vmem>>, vector<64x32xf32>
    %cst_34 = arith.constant dense<0.000000e+00> : vector<1x32xf32>
    %94 = tpu.matmul %87, %93, %cst_34 {dimension_numbers = #tpu.dot_dimension_numbers<[1], [0], [0], [1], [0, 0, 1, 1], [], []>} : vector<1x64xf32>, vector<64x32xf32>, vector<1x32xf32> -> vector<1x32xf32>
    %c0_35 = arith.constant 0 : index
    %c0_36 = arith.constant 0 : index
    %95 = vector.load %arg6[%c0_35, %c0_36] : memref<1x32xf32, #tpu.memory_space<vmem>>, vector<1x32xf32>
    tpu.vector_store %arg6[%c0_35, %c0_36], %94 {strides = array<i32>} : memref<1x32xf32, #tpu.memory_space<vmem>>, vector<1x32xf32>,
    %96 = vector.shape_cast %91 : vector<1x1xf32> to vector<1x1xf32>
    %97 = vector.broadcast %96 : vector<1x1xf32> to vector<1x16xf32>
    %98 = tpu.concatenate %76, %61, %23, %97 in 1 : vector<1x64xf32>, vector<1x32xf32>, vector<1x16xf32>, vector<1x16xf32> -> vector<1x128xf32>
    %99 = arith.index_cast %arg0 : i32 to index
    %c0_37 = arith.constant 0 : index
    %100 = vector.load %arg4[%99, %c0_37] : memref<1x128xf32, #tpu.memory_space<vmem>>, vector<1x128xf32>
    tpu.vector_store %arg4[%99, %c0_37], %98 {strides = array<i32>} : memref<1x128xf32, #tpu.memory_space<vmem>>, vector<1x128xf32>,
    return
  }
  func.func @transform_0(%arg0: i32) -> (i32, i32) {
    %c0_i32 = arith.constant 0 : i32
    %c0_i32_0 = arith.constant 0 : i32
    %c0_i32_1 = arith.constant 0 : i32
    return %c0_i32, %c0_i32_0 : i32, i32
  }
  func.func @transform_1(%arg0: i32) -> (i32, i32) {
    %c0_i32 = arith.constant 0 : i32
    %c0_i32_0 = arith.constant 0 : i32
    %c0_i32_1 = arith.constant 0 : i32
    return %c0_i32, %c0_i32_0 : i32, i32
  }
  func.func @transform_2(%arg0: i32) -> (i32, i32) {
    %c0_i32 = arith.constant 0 : i32
    %c0_i32_0 = arith.constant 0 : i32
    %c0_i32_1 = arith.constant 0 : i32
    return %c0_i32, %c0_i32_0 : i32, i32
  }
  func.func @transform_3(%arg0: i32) -> (i32, i32) {
    %c0_i32 = arith.constant 0 : i32
    %c0_i32_0 = arith.constant 0 : i32
    %c0_i32_1 = arith.constant 0 : i32
    return %c0_i32, %c0_i32_0 : i32, i32
  }
}

</mosaic_0001>

<bundles_post_ra>
// kernel: tpu_custom_call.1
= control target key start
LH: loop header
LB: loop body
LE: loop exit
PB: predicated region body
PF: predicated region fallthrough
CT: control target
= control target key end

     0   :  { %8 = vsyncpa [#allocation5], 0  ;;  %s596_s0 = inlined_call_operand.vmem [shape: f32[64,32], index: 0, kind: input, shape index: {}]   ;;  %s597_s1 = inlined_call_operand.vmem [shape: f32[24,32], index: 1, kind: input, shape index: {}]   ;;  %s598_s2 = inlined_call_operand.hbm [shape: f32[200,128], index: 2, kind: input, shape index: {}]   ;;  %s599_s3 = inlined_call_operand.hbm [shape: f32[1,128], index: 3, kind: output, shape index: {}]  }
   0x1   :  { %9 = vsyncpa [#allocation6], 0  ;;  %s18_s14 = sshll.u32 %s598_s2, 4  ;;  %s490_s15 = smov [#allocation4]   ;;  %s19_s14 = int_to_ptr.hbm [resolvable:$true] %s18_s14 }
   0x2   :  { %s20_s16 = sshll.u32 %s490_s15, 4  ;;  %s491_s17 = smov 128   ;;  %s21_s16 = int_to_ptr.vmem [resolvable:$true] %s20_s16 }
   0x3   :  { %s492_s18 = smov 8  }
   0x4   :  { %26 = dma.hbm_to_vmem [thread:$0]  %s19_s14, 3200, %s21_s16, [#allocation5], %s491_s17, %s491_s17, %s492_s18  }
   0x5   :  { %486 = dma.done.wait [#allocation5], 3200  }
   0x6   :  { %487 = vsyncadd [#allocation5], 4294964096  ;;  %vm36_vm0 = vcmask 253952   ;;  %v73_v0 = vld [vmem:[#allocation4 + $0x38] sm:$0xff]  ;;  %v72_v1 = vld [vmem:[#allocation4 + $0x30] sm:$0xff]  ;;  %vm46_vm1 = vcmask 261120  }
   0x7   :  { %89 = vmatpush.msra.mxu3 %v73_v0  ;;  %v45_v2 = vld [vmem:[#allocation4 + $0x18] sm:$0xff]  ;;  %v71_v4 = vld [vmem:[#allocation4 + $0x28] sm:$0xff]  ;;  %v44_v5 = vld [vmem:[#allocation4 + $0x10] sm:$0xff]  ;;  %vm100_vm2 = vcmask 122880   ;;  %vm127_vm7 = vcmask 130048   ;;  %s494_s26 = smov 112  }
   0x8   :  { %v38_v3 = vld [vmem:[%s597_s1 + $0x1] sm:$0x1]  ;;  %62 = vmatpush.msra.mxu0 %v45_v2  ;;  %v43_v6 = vld [vmem:[#allocation4 + $0x8] sm:$0xff]  ;;  %v35_v7 = vld [vmem:[%s597_s1] sm:$0x1]  ;;  %s495_s27 = smov 32  }
   0x9   :  { %39 = vst.msk [vmem:[#allocation2] sm:$0x1] %vm36_vm0, %v38_v3  ;;  %90 = vmatpush.msra.mxu3 %v72_v1  ;;  %v70_v8 = vld [vmem:[#allocation4 + $0x20] sm:$0xff]  ;;  %v126_v23 = vld [vmem:[%s597_s1 + $0x10] sm:$0xff]  ;;  %v154_v25 = vld [vmem:[#allocation4 + $0x58] sm:$0xff]  ;;  %vm208_vm8 = vcmask 523264  }
   0xa   :  { %63 = vmatpush.msra.mxu0 %v44_v5  ;;  %37 = vst.msk [vmem:[#allocation3] sm:$0x1] %vm36_vm0, %v35_v7  ;;  %v42_v9 = vld [vmem:[#allocation4] sm:$0xff]  ;;  %145 = vmatpush.msra.mxu2 %v126_v23  ;;  %v153_v26 = vld [vmem:[#allocation4 + $0x50] sm:$0xff]  ;;  %v152_v27 = vld [vmem:[#allocation4 + $0x48] sm:$0xff]  ;;  %s496_s28 = smov 64  }
   0xb   :  { %91 = vmatpush.msra.mxu3 %v71_v4  ;;  %v98_v14 = vld [vmem:[#allocation4 + $0xc0] sm:$0x1]  ;;  %v125_v24 = vld [vmem:[%s597_s1 + $0x8] sm:$0xff]  ;;  %s493_s1 = smov 16   ;;  %v183_v43 = vld [vmem:[#allocation4 + $0xc1] sm:$0x1] }
   0xc   :  { %64 = vmatpush.msra.mxu0 %v43_v6  ;;  %146 = vmatpush.msra.mxu2 %v125_v24  ;;  %v151_v28 = vld [vmem:[#allocation4 + $0x40] sm:$0xff]  ;;  %v206_v44 = vld [vmem:[#allocation4 + $0x98] sm:$0xff]  ;;  %v205_v45 = vld [vmem:[#allocation4 + $0x90] sm:$0xff]  ;;  %s497_s29 = smov 96   ;;  %vm301_vm13 = vcmask 516096   ;;  %s395_s21 = sshll.u32 %s599_s3, 4  ;;  %s396_s21 = int_to_ptr.hbm [resolvable:$true] %s395_s21 }
   0xd   :  { %92 = vmatpush.msra.mxu3 %v70_v8  ;;  %v204_v46 = vld [vmem:[#allocation4 + $0x88] sm:$0xff]  ;;  %v203_v53 = vld [vmem:[#allocation4 + $0x80] sm:$0xff]  ;;  %v202_v54 = vld [vmem:[#allocation4 + $0x78] sm:$0xff] }
   0xe   :  { %65 = vmatpush.msra.mxu0 %v42_v9  ;;  %220 = vmatpush.msrb.mxu2 %v206_v44  ;;  %v201_v55 = vld [vmem:[#allocation4 + $0x70] sm:$0xff]  ;;  %v200_v56 = vld [vmem:[#allocation4 + $0x68] sm:$0xff]  ;;  %v199_v57 = vld [vmem:[#allocation4 + $0x60] sm:$0xff] }
   0xf   :  { %170 = vmatpush.msrb.mxu3 %v154_v25  ;;  %v207_v61 = vld [vmem:[#allocation4 + $0xc2] sm:$0x1]  ;;  %v351_v44 = vld [vmem:[%s596_s0 + $0x38] sm:$0xff] }
  0x10   :  { %v531_v10 = vld [vmem:[#allocation2] sm:$0x1]  ;;  %221 = vmatpush.msrb.mxu2 %v205_v45  ;;  %v350_v45 = vld [vmem:[%s596_s0 + $0x30] sm:$0xff]  ;;  %363 = vmatpush.msra.mxu1 %v351_v44 }
  0x11   :  { %406 = vmatmul.msk.f32.vlgmr.msra.gmra.mxu3 %vm46_vm1, %v531_v10  ;;  %v40_v11 = vld [vmem:[#allocation3] sm:$0x1]  ;;  %v194_v52 = vperm.slane %v531_v10, 0 }
  0x12   :  { %405 = vmatmul.msk.f32.vlgmr.msra.gmra.mxu0 %vm46_vm1, %v40_v11  ;;  %171 = vmatpush.msrb.mxu3 %v153_v26 }
  0x13   :  { %222 = vmatpush.msrb.mxu2 %v204_v46  ;;  %v349_v46 = vld [vmem:[%s596_s0 + $0x28] sm:$0xff]  ;;  %364 = vmatpush.msra.mxu1 %v350_v45 }
  0x14   :  { %172 = vmatpush.msrb.mxu3 %v152_v27 }
  0x15   :  { %223 = vmatpush.msrb.mxu2 %v203_v53  ;;  %365 = vmatpush.msra.mxu1 %v349_v46  ;;  %v346_v53 = vld [vmem:[%s596_s0 + $0x10] sm:$0xff] }
  0x16   :  { %173 = vmatpush.msrb.mxu3 %v151_v28  ;;  %v299_v28 = vld [vmem:[#allocation4 + $0xc3] sm:$0x1] }
  0x17   :  { %224 = vmatpush.msrb.mxu2 %v202_v54  ;;  %v345_v54 = vld [vmem:[%s596_s0 + $0x8] sm:$0xff] }
  0x19   :  { %225 = vmatpush.msrb.mxu2 %v201_v55  ;;  %v344_v55 = vld [vmem:[%s596_s0] sm:$0xff] }
  0x1b   :  { %226 = vmatpush.msrb.mxu2 %v200_v56 }
  0x1d   :  { %227 = vmatpush.msrb.mxu2 %v199_v57 }
  0x8f   :  { %v67_v12 = vpop.f32.mrf.mxu0 }
  0x94   :  { %v94_v13 = vpop.f32.mrf.mxu3 }
  0x95   :  { %v97_v15 = vadd.f32 %v94_v13, %v67_v12 }
  0x97   :  { %v99_v16 = vadd.f32 %v98_v14, %v97_v15 }
  0x99   :  { %v101_v17 = vsel %vm100_vm2, %v99_v16, -inf }
  0x9a   :  { %102 = vmax.xlane.f32.xlu0 %v101_v17 }
 0x10d   :  { %v103_v18 = vpop.xlane.xlu0 %102 }
 0x10e   :  { %v104_v19 = vsub.f32 %v99_v16, %v103_v18  ;;  %v273_v18 = vld [vmem:[#allocation4 + $0xb8] sm:$0xff] }
 0x10f   :  { %291 = vmatpush.msrb.mxu0 %v273_v18 }
 0x110   :  { %v105_v20 = vmul.f32 1.442695, %v104_v19  ;;  %v272_v19 = vld [vmem:[#allocation4 + $0xb0] sm:$0xff] }
 0x111   :  { %292 = vmatpush.msrb.mxu0 %v272_v19 }
 0x112   :  { %424 = vpow2.f32 %v105_v20  ;;  %v271_v20 = vld [vmem:[#allocation4 + $0xa8] sm:$0xff] }
 0x113   :  { %293 = vmatpush.msrb.mxu0 %v271_v20 }
 0x118   :  { %v425_v21 = vpop.eup %424 }
 0x119   :  { %v107_v22 = vsel %vm100_vm2, %v425_v21, 0.0  ;;  %vm383_vm2 = vcmask 785408  }
 0x11a   :  { %108 = vadd.xlane.f32.xlu0 %v107_v22 }
 0x18d   :  { %v109_v29 = vpop.xlane.xlu0 %108 }
 0x18e   :  { %426 = vrcp.f32 %v109_v29  ;;  %v121_v33 = vand.u32 2147483648, %v109_v29  ;;  %v119_v35 = vand.u32 2147483647, %v109_v29  ;;  %vm115_vm4 = vweird.f32 %v109_v29 }
 0x190   :  { %v122_v37 = vor.u32 1.1754944e-38, %v121_v33  ;;  %vm120_vm6 = vcmp.eq.f32.partialorder %v119_v35, 8.507059e+37 }
 0x194   :  { %v427_v30 = vpop.eup %426 }
 0x195   :  { %v111_v31 = vmul.f32 %v427_v30, %v109_v29  ;;  %vm116_vm3 = vweird.f32 %v427_v30 }
 0x196   :  { %vm117_vm5 = vmor %vm115_vm4, %vm116_vm3  ;;  %vm385_vm3 = vcmask 916480  }
 0x197   :  { %v112_v32 = vsub.f32 1.0, %v111_v31 }
 0x199   :  { %v113_v34 = vmul.f32 %v427_v30, %v112_v32  ;;  %v314_v32 = vlaneseq }
 0x19b   :  { %v114_v36 = vadd.f32 %v427_v30, %v113_v34  ;;  %v315_v33 = vand.u32 127, %v314_v32 }
 0x19d   :  { %v118_v38 = vsel %vm117_vm5, %v427_v30, %v114_v36 }
 0x19e   :  { %v123_v39 = vsel %vm120_vm6, %v122_v37, %v118_v38 }
 0x19f   :  { %v542_v40 = vmul.f32 %v425_v21, %v123_v39  ;;  %v270_v21 = vld [vmem:[#allocation4 + $0xa0] sm:$0xff] }
 0x1a0   :  { %294 = vmatpush.msrb.mxu0 %v270_v21 }
 0x1a1   :  { %407 = vmatmul.msk.f32.vlgmr.msra.gmra.mxu2 %vm127_vm7, %v542_v40 }
 0x224   :  { %v148_v41 = vpop.f32.mrf.mxu2 }
 0x225   :  { %408 = vmatmul.msk.f32.vlgmr.msrb.gmra.mxu3 %vm46_vm1, %v148_v41 }
 0x2a8   :  { %v175_v42 = vpop.f32.mrf.mxu3 }
 0x2a9   :  { %179 = vrot.lane.b32.xlu1 %v175_v42, %s493_s1 }
 0x2b1   :  { %185 = vrot.lane.b32.xlu1 %v183_v43, %s493_s1 }
 0x31b   :  { %v180_v47 = vpop.permute.xlu1 %179 }
 0x31c   :  { %v182_v48 = vadd.f32 %v180_v47, %v67_v12  ;;  %v348_v47 = vld [vmem:[%s596_s0 + $0x20] sm:$0xff] }
 0x31d   :  { %366 = vmatpush.msra.mxu1 %v348_v47 }
 0x323   :  { %v186_v49 = vpop.permute.xlu1 %185 }
 0x324   :  { %v188_v50 = vadd.f32 %v186_v49, %v182_v48  ;;  %v347_v49 = vld [vmem:[%s596_s0 + $0x18] sm:$0xff]  ;;  %s499_s0 = smov [#allocation7]  }
 0x325   :  { %367 = vmatpush.msra.mxu1 %v347_v49  ;;  %s393_s19 = sshll.u32 %s499_s0, 4  ;;  %s394_s19 = int_to_ptr.vmem [resolvable:$true] %s393_s19 }
 0x326   :  { %v189_v51 = vmax.f32 %v188_v50, 0.0 }
 0x327   :  { %368 = vmatpush.msra.mxu1 %v346_v53 }
 0x328   :  { %191 = vrot.lane.b32.xlu2 %v189_v51, %s494_s26 }
 0x329   :  { %369 = vmatpush.msra.mxu1 %v345_v54 }
 0x32b   :  { %370 = vmatpush.msra.mxu1 %v344_v55 }
 0x330   :  { %195 = vrot.lane.b32.xlu2 %v194_v52, %s495_s27 }
 0x382   :  { %v192_v58 = vpop.permute.xlu2 %191 }
 0x38a   :  { %v196_v59 = vpop.permute.xlu2 %195 }
 0x38b   :  { %v198_v60 = vsel %vm46_vm1, %v192_v58, %v196_v59 }
 0x38c   :  { %409 = vmatmul.msk.f32.vlgmr.msrb.gmra.mxu2 %vm208_vm8, %v198_v60  ;;  %v336_v60 = vcvt.s32.f32 %v315_v33 }
 0x40f   :  { %v229_v62 = vpop.f32.mrf.mxu2 }
 0x410   :  { %v230_v63 = vadd.f32 %v229_v62, %v207_v61  ;;  %v498_v61 = vmov 0.0  }
 0x412   :  { %252 = vrot.lane.b32.xlu0 %v230_v63, %s495_s27  ;;  %v410_v0 = vmul.f32 -1.442695, %v230_v63 }
 0x414   :  { %428 = vpow2.f32 %v410_v0 }
 0x41a   :  { %v429_v1 = vpop.eup %428 }
 0x41b   :  { %v235_v2 = vadd.f32 1.0, %v429_v1 }
 0x41d   :  { %430 = vrcp.f32 %v235_v2  ;;  %v247_v8 = vand.u32 2147483648, %v235_v2  ;;  %vm241_vm10 = vweird.f32 %v235_v2  ;;  %v245_v9 = vand.u32 2147483647, %v235_v2 }
 0x41f   :  { %v248_v11 = vor.u32 1.1754944e-38, %v247_v8  ;;  %vm246_vm12 = vcmp.eq.f32.partialorder %v245_v9, 8.507059e+37 }
 0x423   :  { %v431_v3 = vpop.eup %430 }
 0x424   :  { %v237_v4 = vmul.f32 %v431_v3, %v235_v2  ;;  %vm242_vm9 = vweird.f32 %v431_v3 }
 0x425   :  { %vm243_vm11 = vmor %vm241_vm10, %vm242_vm9 }
 0x426   :  { %v238_v5 = vsub.f32 1.0, %v237_v4 }
 0x428   :  { %v239_v6 = vmul.f32 %v431_v3, %v238_v5 }
 0x42a   :  { %v240_v7 = vadd.f32 %v431_v3, %v239_v6 }
 0x42c   :  { %v244_v10 = vsel %vm243_vm11, %v431_v3, %v240_v7 }
 0x42d   :  { %v249_v13 = vsel %vm246_vm12, %v248_v11, %v244_v10 }
 0x42e   :  { %v262_v22 = vsub.f32 1.0, %v249_v13  ;;  %v268_v24 = vmul.f32 %v249_v13, %v196_v59 }
 0x484   :  { %v253_v12 = vpop.permute.xlu0 %252 }
 0x485   :  { %v255_v14 = vmul.f32 %v253_v12, %v249_v13 }
 0x487   :  { %257 = vrot.lane.b32.xlu1 %v255_v14, %s496_s28 }
 0x4f9   :  { %v258_v15 = vpop.permute.xlu1 %257 }
 0x4fa   :  { %v260_v16 = vadd.f32 %v258_v15, %v230_v63 }
 0x4fc   :  { %432 = vtanh.f32 %v260_v16 }
 0x502   :  { %v433_v17 = vpop.eup %432 }
 0x503   :  { %264 = vrot.lane.b32.xlu2 %v433_v17, %s497_s29 }
 0x55d   :  { %v265_v23 = vpop.permute.xlu2 %264 }
 0x55e   :  { %v267_v25 = vmul.f32 %v265_v23, %v262_v22 }
 0x560   :  { %v269_v26 = vadd.f32 %v268_v24, %v267_v25 }
 0x562   :  { %275 = vrot.lane.b32.xlu1 %v269_v26, %s497_s29 }
 0x5d4   :  { %v276_v27 = vpop.permute.xlu1 %275 }
 0x5d5   :  { %343 = vst.msk [vmem:[#allocation2] sm:$0x1] %vm36_vm0, %v276_v27  ;;  %411 = vmatmul.msk.f32.vlgmr.msrb.gmra.mxu0 %vm46_vm1, %v276_v27 }
 0x652   :  { %v296_v29 = vpop.f32.mrf.mxu0 }
 0x653   :  { %v300_v30 = vadd.f32 %v299_v28, %v296_v29 }
 0x655   :  { %v302_v31 = vsel %vm301_vm13, %v300_v30, -inf }
 0x656   :  { %303 = vmax.xlane.f32.xlu2 %v302_v31 }
 0x6c9   :  { %v304_v34 = vpop.xlane.xlu2 %303 }
 0x6ca   :  { %v556_v35 = vsub.f32 %v300_v30, %v304_v34  ;;  %vm316_vm14 = vcmp.ge.f32.partialorder %v300_v30, %v304_v34 }
 0x6cb   :  { %v317_v36 = vsel %vm316_vm14, %v315_v33, 64 }
 0x6cc   :  { %v306_v37 = vmul.f32 1.442695, %v556_v35  ;;  %v318_v38 = vsel %vm301_vm13, %v317_v36, 2147483647 }
 0x6cd   :  { %v320_v39 = vshra.s32 %v318_v38, 16  ;;  %v319_v48 = vand.u32 65535, %v318_v38 }
 0x6ce   :  { %434 = vpow2.f32 %v306_v37 }
 0x6cf   :  { %v322_v41 = vcvt.s32.f32 %v320_v39  ;;  %v321_v51 = vcvt.s32.f32 %v319_v48 }
 0x6d1   :  { %323 = vmin.xlane.f32.xlu1 %v322_v41 }
 0x6d4   :  { %v435_v42 = vpop.eup %434 }
 0x6d5   :  { %v308_v43 = vsel %vm301_vm13, %v435_v42, 0.0 }
 0x6d6   :  { %309 = vadd.xlane.f32.xlu2 %v308_v43 }
 0x6ee   :  { %376 = vrot.lane.b32.xlu2 %v269_v26, %s495_s27 }
 0x744   :  { %v324_v50 = vpop.xlane.xlu1 %323 }
 0x745   :  { %vm325_vm15 = vcmp.eq.f32.partialorder %v322_v41, %v324_v50  ;;  %v330_v56 = vcvt.f32.s32 %v324_v50 }
 0x746   :  { %v326_v52 = vsel %vm325_vm15, %v321_v51, inf }
 0x747   :  { %327 = vmin.xlane.f32.xlu0 %v326_v52  ;;  %v331_v58 = vshll.u32 %v330_v56, 16 }
 0x749   :  { %v310_v1 = vpop.xlane.xlu2 %309 }
 0x74a   :  { %436 = vlog2.f32 %v310_v1 }
 0x750   :  { %v437_v2 = vpop.eup %436 }
 0x751   :  { %v312_v3 = vmul.f32 0.6931472, %v437_v2  ;;  %v377_v6 = vpop.permute.xlu2 %376 }
 0x753   :  { %v313_v4 = vsub.f32 %v556_v35, %v312_v3 }
 0x755   :  { %v382_v7 = vsel %vm208_vm8, %v313_v4, %v377_v6 }
 0x75b   :  { %379 = vrot.lane.b32.xlu0 %v542_v40, %s497_s29 }
 0x7ba   :  { %v328_v57 = vpop.xlane.xlu0 %327 }
 0x7bb   :  { %v329_v59 = vcvt.f32.s32 %v328_v57 }
 0x7bd   :  { %v332_v40 = vadd.s32 %v331_v58, %v329_v59 }
 0x7bf   :  { %vm333_vm1 = vcmp.eq.s32.totalorder %v317_v36, %v332_v40 }
 0x7c0   :  { %v412_v62 = vsel %vm333_vm1, 1.0, %v498_v61 }
 0x7c1   :  { %413 = vmatmul.msk.f32.vlgmr.msra.gmra.mxu1 %vm208_vm8, %v412_v62  ;;  %v337_v63 = vmul.f32 %v412_v62, %v336_v60 }
 0x7c3   :  { %v338_v0 = vsel %vm301_vm13, %v337_v63, 0.0 }
 0x7c4   :  { %339 = vadd.xlane.f32.xlu1 %v338_v0 }
 0x7cd   :  { %v380_v5 = vpop.permute.xlu0 %379 }
 0x7ce   :  { %v384_v8 = vsel %vm383_vm2, %v382_v7, %v380_v5 }
 0x837   :  { %v340_v9 = vpop.xlane.xlu1 %339 }
 0x838   :  { %v386_v10 = vsel %vm385_vm3, %v384_v8, %v340_v9 }
 0x839   :  { %387 = vst [vmem:[#allocation7] sm:$0x1] %v386_v10 }
 0x83a   :  { %398 = dma.vmem_to_hbm [thread:$0]  %s394_s19, 16, %s396_s21, [#allocation6]  }
 0x83e   :  { %v372_v11 = vpop.f32.mrf.mxu1 }
 0x83f   :  { %375 = vst.msk [vmem:[#allocation3] sm:$0x1] %vm36_vm0, %v372_v11 }
 0x840   :  { %488 = dma.done.wait [#allocation6], 16  }
 0x841   :  { %489 = vsyncadd [#allocation6], 4294967280 }
 0x842   :  { %403 = vsyncpa [#allocation5], 1 }
 0x843   :  { %404 = vsyncpa [#allocation6], 1 }

</bundles_post_ra>
